<compile_context>
chip_gen: v5e
topology: v5e:2x2
jax: 0.10.0
libtpu: 0.0.40
codegen_flags: <defaults>
</compile_context>

<pallas_src>
import functools

import jax
import jax.numpy as jnp
from jax.experimental import pallas as pl
from jax.experimental.pallas import tpu as pltpu


# --------------------------------------------------------------------------- #
# Kernel 1: router                                                             #
# --------------------------------------------------------------------------- #
def _router_kernel(h_ref, wcls_ref, logits_ref, prob_ref, eidx_ref, slot_ref,
                   *, num_experts, expert_capacity):
    S = h_ref.shape[1]
    Ep = wcls_ref.shape[1]                      # expert dim padded to 128 lanes (MXU)

    # classifier in router_dtype = float32 (Linear, no bias)
    h32 = h_ref[0].astype(jnp.float32)                                  # [S, H]
    logits = jnp.dot(h32, wcls_ref[...],
                     preferred_element_type=jnp.float32)                # [S, Ep]
    col = jax.lax.broadcasted_iota(jnp.int32, (S, Ep), 1)
    logits = jnp.where(col < num_experts, logits, jnp.float32(-1e30))
    # exact-E writeback (no padded HBM store, no wrapper slice)
    logits_ref[0] = logits[:, :num_experts].astype(logits_ref.dtype)

    # max softmax prob without materializing probs:
    #   argmax(softmax(x)) == argmax(x);  max prob == 1 / sum(exp(x - max(x)))
    m = jnp.max(logits, axis=-1, keepdims=True)                         # [S, 1]
    denom = jnp.sum(jnp.exp(logits - m), axis=-1, keepdims=True)        # [S, 1]
    prob_ref[0] = pl.reciprocal(denom)                                  # exact 1/denom

    # top-1 expert (first-max tie break, like torch.argmax)
    top1 = jnp.min(jnp.where(logits == m, col, Ep), axis=-1, keepdims=True)  # [S, 1]
    one_hot = (col == top1).astype(jnp.float32)                         # [S, Ep]

    # inclusive prefix sum over the token axis: Hillis-Steele scan,
    # log2(S) sublane rolls + masked adds (no SxS tril, no MXU waste).
    row = jax.lax.broadcasted_iota(jnp.int32, (S, Ep), 0)
    prio = one_hot
    d = 1
    while d < S:
        shifted = pltpu.roll(prio, shift=d, axis=0)
        prio = prio + jnp.where(row >= d, shifted, 0.0)
        d *= 2

    # 1-based position of this token inside its chosen expert; capacity check.
    pos = jnp.sum(jnp.where(col == top1, prio, 0.0), axis=-1, keepdims=True)  # [S, 1]
    routed = pos <= jnp.float32(expert_capacity)                              # [S, 1]

    # expert_index: torch.argmax of the capacity-masked one-hot (dropped rows -> 0)
    eidx_ref[0] = jnp.where(routed, top1, 0).astype(jnp.int32)
    # capacity slot for dispatch: 0..capacity-1 if routed, -1 if dropped
    slot_ref[0] = jnp.where(routed, pos.astype(jnp.int32) - 1, -1).astype(jnp.int32)


# --------------------------------------------------------------------------- #
# Kernel 2: gather routed tokens -> expert FFN (F-tiled) -> scatter + combine  #
# --------------------------------------------------------------------------- #
def _expert_ffn_kernel(h_ref, eidx_ref, slot_ref, prob_ref, wi_ref, wo_ref,
                       out_ref, xg_s, acc_s, comb_s,
                       *, cap_pad, group_block):
    e = pl.program_id(1)
    k = pl.program_id(2)
    last_e = pl.num_programs(1) - 1
    last_k = pl.num_programs(2) - 1
    S = h_ref.shape[1]
    Cp = cap_pad
    Gb = group_block

    def dispatch_mask(g):
        # [S, Cp] one-hot: token s of group g occupies capacity slot c of expert e.
        c_iota = jax.lax.broadcasted_iota(jnp.int32, (S, Cp), 1)
        sel = (eidx_ref[g] == e) & (slot_ref[g] == c_iota)
        return sel.astype(jnp.float32)

    @pl.when((e == 0) & (k == 0))
    def _init_combine():
        # dropped / over-capacity tokens keep their original hidden state
        for g in range(Gb):
            dropped = (slot_ref[g] < 0).astype(jnp.float32)             # [S, 1]
            comb_s[g] = dropped * h_ref[g].astype(jnp.float32)

    @pl.when(k == 0)
    def _gather():
        acc_s[...] = jnp.zeros_like(acc_s)
        for g in range(Gb):
            gt = dispatch_mask(g)                                       # [S, Cp]
            xg = jax.lax.dot_general(                                   # [Cp, H] exact gather
                gt, h_ref[g].astype(jnp.float32),
                (((0,), (0,)), ((), ())),
                preferred_element_type=jnp.float32)
            xg_s[g * Cp:(g + 1) * Cp, :] = xg.astype(xg_s.dtype)

    # FFN on the current d_ff tile (torch weight layout, consumed without transposes):
    #   wi tile [tF, H]  :  t  = relu(x @ wi^T)
    #   wo tile [H, tF]  :  y += t @ wo^T
    wi = wi_ref[0]
    wo = wo_ref[0]
    x = xg_s[...]                                                       # [Gb*Cp, H]
    t = jax.lax.dot_general(x, wi, (((1,), (1,)), ((), ())),
                            preferred_element_type=jnp.float32)         # [Gb*Cp, tF]
    t = jnp.maximum(t, 0.0)                                             # relu (dropout=id)
    acc_s[...] += jax.lax.dot_general(t.astype(wo.dtype), wo,
                                      (((1,), (1,)), ((), ())),
                                      preferred_element_type=jnp.float32)  # [Gb*Cp, H]

    @pl.when(k == last_k)
    def _combine():
        for g in range(Gb):
            gt = dispatch_mask(g)                                       # [S, Cp]
            yg = acc_s[g * Cp:(g + 1) * Cp, :]                          # [Cp, H]
            comb_s[g] += jnp.dot(gt, yg, preferred_element_type=jnp.float32)

    @pl.when((e == last_e) & (k == last_k))
    def _finalize():
        for g in range(Gb):
            out_ref[g] = (prob_ref[g] * comb_s[g]).astype(out_ref.dtype)


# --------------------------------------------------------------------------- #
# Wrapper                                                                      #
# --------------------------------------------------------------------------- #
def _pick_group_block(B, S, H, itemsize, budget=4 << 20, max_tokens=4096):
    gb = 1
    for d in range(1, B + 1):
        if B % d == 0 and d * S * H * itemsize <= budget and d * S <= max_tokens:
            gb = d
    return gb


def _pick_f_block(F, H, w_itemsize, budget=8 << 20):
    # whole F if the double-buffered wi+wo tiles stay small; else a 128-multiple divisor
    if 4 * F * H * w_itemsize <= budget or F % 128 != 0:
        return F
    cands = [d for d in range(128, F + 1, 128) if F % d == 0]
    fitting = [d for d in cands if 4 * d * H * w_itemsize <= budget]
    return max(fitting) if fitting else min(cands)


def _clamp_vmem(nbytes):
    # floor at the default scoped limit, cap below physical VMEM (64 MiB on v7x).
    return int(min(max(nbytes, 32 << 20), 96 << 20))


def gptsan_sparse_mlp(hidden_states, classifier_weight, wi_weight, wo_weight, *,
                      expert_capacity, f_block=None, group_block=None):
    """Forward pass of GPTSanJapaneseSparseMLP (eval mode).

    Args:
      hidden_states:     [B, S, H]     (num_groups, tokens_per_group, hidden)
      classifier_weight: [E, H]        router classifier (torch Linear layout, no bias)
      wi_weight:         [E, d_ff, H]  stacked expert wi (torch layout, no bias)
      wo_weight:         [E, H, d_ff]  stacked expert wo (torch layout, no bias)
    Returns:
      (hidden_states_out [B,S,H], (router_logits [B,S,E], expert_index [B,S]))
    """
    B, S, H = hidden_states.shape
    E = classifier_weight.shape[0]
    F = wi_weight.shape[1]
    dt = hidden_states.dtype

    # ------------------------------ router pass ------------------------------ #
    Ep = 128 * pl.cdiv(E, 128)            # lane-padded classifier for the MXU matmul
    wcls = jnp.zeros((H, Ep), jnp.float32).at[:, :E].set(
        classifier_weight.astype(jnp.float32).T)

    router_vmem = (2 * S * H * dt.itemsize + 2 * H * Ep * 4
                   + 2 * S * (E + 3) * 4 + (4 << 20))
    logits, probs, eidx, slot = pl.pallas_call(
        functools.partial(_router_kernel, num_experts=E,
                          expert_capacity=expert_capacity),
        out_shape=(
            jax.ShapeDtypeStruct((B, S, E), jnp.float32),   # router logits (exact E)
            jax.ShapeDtypeStruct((B, S, 1), jnp.float32),   # max softmax prob
            jax.ShapeDtypeStruct((B, S, 1), jnp.int32),     # routed expert index
            jax.ShapeDtypeStruct((B, S, 1), jnp.int32),     # capacity slot (-1 = dropped)
        ),
        grid_spec=pltpu.PrefetchScalarGridSpec(
            num_scalar_prefetch=0, grid=(B,),
            in_specs=[pl.BlockSpec((1, S, H), lambda b: (b, 0, 0)),
                      pl.BlockSpec((H, Ep), lambda b: (0, 0))],
            out_specs=[pl.BlockSpec((1, S, E), lambda b: (b, 0, 0)),
                       pl.BlockSpec((1, S, 1), lambda b: (b, 0, 0)),
                       pl.BlockSpec((1, S, 1), lambda b: (b, 0, 0)),
                       pl.BlockSpec((1, S, 1), lambda b: (b, 0, 0))]),
        compiler_params=pltpu.CompilerParams(
            dimension_semantics=("parallel",),
            vmem_limit_bytes=_clamp_vmem(router_vmem)),
    )(hidden_states, wcls)

    # -------------------- grouped expert FFN + combine ----------------------- #
    Gb = group_block if group_block is not None else _pick_group_block(
        B, S, H, dt.itemsize)
    assert B % Gb == 0
    tF = f_block if f_block is not None else _pick_f_block(
        F, H, wi_weight.dtype.itemsize)
    assert F % tF == 0 and (tF == F or tF % 128 == 0)
    Kf = F // tF
    # capacity padded to a sublane multiple; slot values live in [0, min(cap, S))
    Cp = max(8, -(-min(expert_capacity, S) // 8) * 8)

    witm = wi_weight.dtype.itemsize
    ffn_vmem = (2 * Gb * S * H * dt.itemsize            # hidden in (double buffered)
                + 2 * 3 * Gb * S * 4                     # eidx / slot / prob
                + 2 * 2 * tF * H * witm                  # wi + wo tiles
                + 2 * Gb * S * H * dt.itemsize           # output
                + Gb * Cp * H * (dt.itemsize + 4)        # xg + FFN accumulator scratch
                + Gb * S * H * 4                         # combine scratch
                + (4 << 20))

    out = pl.pallas_call(
        functools.partial(_expert_ffn_kernel, cap_pad=Cp, group_block=Gb),
        out_shape=jax.ShapeDtypeStruct((B, S, H), dt),
        grid_spec=pltpu.PrefetchScalarGridSpec(
            num_scalar_prefetch=0,
            grid=(B // Gb, E, Kf),
            in_specs=[pl.BlockSpec((Gb, S, H), lambda g, e, k: (g, 0, 0)),
                      pl.BlockSpec((Gb, S, 1), lambda g, e, k: (g, 0, 0)),
                      pl.BlockSpec((Gb, S, 1), lambda g, e, k: (g, 0, 0)),
                      pl.BlockSpec((Gb, S, 1), lambda g, e, k: (g, 0, 0)),
                      pl.BlockSpec((1, tF, H), lambda g, e, k: (e, k, 0)),   # wi[e] F-tile
                      pl.BlockSpec((1, H, tF), lambda g, e, k: (e, 0, k))],  # wo[e] F-tile
            out_specs=pl.BlockSpec((Gb, S, H), lambda g, e, k: (g, 0, 0)),
            scratch_shapes=[pltpu.VMEM((Gb * Cp, H), dt),          # gathered expert inputs
                            pltpu.VMEM((Gb * Cp, H), jnp.float32),  # FFN accumulator
                            pltpu.VMEM((Gb, S, H), jnp.float32)]),  # combined output acc
        compiler_params=pltpu.CompilerParams(
            dimension_semantics=("parallel", "arbitrary", "arbitrary"),
            vmem_limit_bytes=_clamp_vmem(ffn_vmem)),
    )(hidden_states, eidx, slot, probs, wi_weight, wo_weight)

    expert_index = eidx[:, :, 0]
    return out, (logits, expert_index)


# --------------------------------------------------------------------------- #
# Plain-JAX reference (mirror of the PyTorch forward, eval mode)               #
# --------------------------------------------------------------------------- #
def _reference(hidden_states, classifier_weight, wi_weight, wo_weight, expert_capacity):
    E = classifier_weight.shape[0]
    h = hidden_states.astype(jnp.float32)
    with jax.default_matmul_precision("highest"):
        logits = jnp.einsum("bsh,eh->bse", h, classifier_weight.astype(jnp.float32))
        probs = jax.nn.softmax(logits, axis=-1)
        top1 = jnp.argmax(probs, axis=-1)
        one_hot = jax.nn.one_hot(top1, E, dtype=jnp.int32)
        prio = jnp.cumsum(one_hot, axis=-2)
        mask = one_hot * (prio <= expert_capacity)                    # [B,S,E]
        router_probs = jnp.max(probs, axis=-1, keepdims=True)         # [B,S,1]
        expert_index = jnp.argmax(mask, axis=-1)                      # [B,S]

        ffn = []
        for e in range(E):
            x = jnp.maximum(jnp.einsum("bsh,fh->bsf", h, wi_weight[e]), 0.0)
            ffn.append(jnp.einsum("bsf,hf->bsh", x, wo_weight[e]))
        ffn = jnp.stack(ffn, axis=2)                                  # [B,S,E,H]
        maskf = mask.astype(jnp.float32)[..., None]
        routed_any = mask.sum(-1, keepdims=True).astype(jnp.float32)  # [B,S,1]
        next_states = (1.0 - routed_any) * h + jnp.sum(maskf * ffn, axis=2)
        out = router_probs * next_states
    return out.astype(hidden_states.dtype), logits, expert_index


if __name__ == "__main__":
    # Small config consistent with the module:
    #   num_groups=2, tokens_per_group=8, hidden=32, d_ff=64, num_experts=8, capacity=3
    B, S, H, F, E = 2, 8, 32, 64, 8
    expert_capacity = 3

    key = jax.random.PRNGKey(0)
    k_h, k_c, k_i, k_o = jax.random.split(key, 4)
    hidden_states = jax.random.normal(k_h, (B, S, H), dtype=jnp.float32)
    classifier_weight = jax.random.normal(k_c, (E, H), dtype=jnp.float32) / jnp.sqrt(H)
    wi_weight = jax.random.normal(k_i, (E, F, H), dtype=jnp.float32) / jnp.sqrt(H)
    wo_weight = jax.random.normal(k_o, (E, H, F), dtype=jnp.float32) / jnp.sqrt(F)

    out, (router_logits, expert_index) = jax.block_until_ready(
        gptsan_sparse_mlp(hidden_states, classifier_weight, wi_weight, wo_weight,
                          expert_capacity=expert_capacity))

    ref_out, ref_logits, ref_idx = _reference(hidden_states, classifier_weight,
                                              wi_weight, wo_weight, expert_capacity)

    assert out.shape == (B, S, H)
    assert router_logits.shape == (B, S, E)
    assert expert_index.shape == (B, S)
    assert jnp.array_equal(expert_index, ref_idx.astype(expert_index.dtype))
    assert jnp.allclose(router_logits, ref_logits, atol=1e-4)
    assert jnp.allclose(out, ref_out, atol=2e-3, rtol=2e-3)
    print("KERNEL_OK")
</pallas_src>

<mosaic_0001>
module attributes {stable_mosaic.version = 11 : i64} {
  func.func @_router_kernel(%arg0: i32, %arg1: memref<1x8x32xf32, #tpu.memory_space<vmem>>, %arg2: memref<32x128xf32, #tpu.memory_space<vmem>>, %arg3: memref<1x8x8xf32, #tpu.memory_space<vmem>>, %arg4: memref<1x8x1xf32, #tpu.memory_space<vmem>>, %arg5: memref<1x8x1xi32, #tpu.memory_space<vmem>>, %arg6: memref<1x8x1xi32, #tpu.memory_space<vmem>>) attributes {dimension_semantics = [#tpu.dimension_semantics<parallel>], iteration_bounds = array<i64: 2>, scalar_prefetch = 0 : i64, scratch_operands = 0 : i64, tpu.core_type = #tpu.core_type<tc>, window_params = [{transform_indices = @transform_0, window_bounds = array<i64: 1, 8, 32>}, {pipeline_mode = #tpu.pipeline_mode<synchronous>, transform_indices = @transform_1, window_bounds = array<i64: 32, 128>}, {transform_indices = @transform_2, window_bounds = array<i64: 1, 8, 8>}, {transform_indices = @transform_3, window_bounds = array<i64: 1, 8, 1>}, {transform_indices = @transform_4, window_bounds = array<i64: 1, 8, 1>}, {transform_indices = @transform_5, window_bounds = array<i64: 1, 8, 1>}]} {
    %c0 = arith.constant 0 : index
    %c0_0 = arith.constant 0 : index
    %c0_1 = arith.constant 0 : index
    %0 = vector.load %arg1[%c0, %c0_0, %c0_1] : memref<1x8x32xf32, #tpu.memory_space<vmem>>, vector<1x8x32xf32>
    %1 = vector.shape_cast %0 : vector<1x8x32xf32> to vector<8x32xf32>
    %c0_2 = arith.constant 0 : index
    %c0_3 = arith.constant 0 : index
    %2 = vector.load %arg2[%c0_2, %c0_3] : memref<32x128xf32, #tpu.memory_space<vmem>>, vector<32x128xf32>
    %cst = arith.constant dense<0.000000e+00> : vector<8x128xf32>
    %3 = tpu.matmul %1, %2, %cst {dimension_numbers = #tpu.dot_dimension_numbers<[1], [0], [0], [1], [0, 0, 1, 1], [], []>} : vector<8x32xf32>, vector<32x128xf32>, vector<8x128xf32> -> vector<8x128xf32>
    %4 = tpu.iota {dimensions = array<i32: 1>} : vector<8x128xi32>
    %c8_i32 = arith.constant 8 : i32
    %5 = vector.broadcast %c8_i32 : i32 to vector<8x128xi32>
    %6 = arith.cmpi slt, %4, %5 : vector<8x128xi32>
    %cst_4 = arith.constant -1.000000e+30 : f32
    %7 = vector.broadcast %cst_4 : f32 to vector<8x128xf32>
    %8 = arith.select %6, %3, %7 : vector<8x128xi1>, vector<8x128xf32>
    %9 = vector.extract_strided_slice %8 {offsets = [0, 0], sizes = [8, 8], strides = [1, 1]} : vector<8x128xf32> to vector<8x8xf32>
    %c0_5 = arith.constant 0 : index
    %c0_6 = arith.constant 0 : index
    %c0_7 = arith.constant 0 : index
    %10 = vector.load %arg3[%c0_5, %c0_6, %c0_7] : memref<1x8x8xf32, #tpu.memory_space<vmem>>, vector<1x8x8xf32>
    %11 = vector.shape_cast %10 : vector<1x8x8xf32> to vector<8x8xf32>
    %12 = vector.shape_cast %9 : vector<8x8xf32> to vector<1x8x8xf32>
    tpu.vector_store %arg3[%c0_5, %c0_6, %c0_7], %12 {strides = array<i32>} : memref<1x8x8xf32, #tpu.memory_space<vmem>>, vector<1x8x8xf32>,
    %cst_8 = arith.constant dense<0xFF800000> : vector<8xf32>
    %13 = vector.multi_reduction <maximumf>, %8, %cst_8 [1] : vector<8x128xf32> to vector<8xf32>
    %14 = vector.shape_cast %13 : vector<8xf32> to vector<8x1xf32>
    %15 = vector.broadcast %14 : vector<8x1xf32> to vector<8x128xf32>
    %16 = arith.subf %8, %15 : vector<8x128xf32>
    %17 = math.exp %16 : vector<8x128xf32>
    %cst_9 = arith.constant dense<0.000000e+00> : vector<8xf32>
    %18 = vector.multi_reduction <add>, %17, %cst_9 [1] : vector<8x128xf32> to vector<8xf32>
    %19 = vector.shape_cast %18 : vector<8xf32> to vector<8x1xf32>
    %20 = tpu.reciprocal %19 : vector<8x1xf32> -> vector<8x1xf32>
    %c0_10 = arith.constant 0 : index
    %c0_11 = arith.constant 0 : index
    %c0_12 = arith.constant 0 : index
    %21 = vector.load %arg4[%c0_10, %c0_11, %c0_12] : memref<1x8x1xf32, #tpu.memory_space<vmem>>, vector<1x8x1xf32>
    %22 = vector.shape_cast %21 : vector<1x8x1xf32> to vector<8x1xf32>
    %23 = vector.shape_cast %20 : vector<8x1xf32> to vector<1x8x1xf32>
    tpu.vector_store %arg4[%c0_10, %c0_11, %c0_12], %23 {strides = array<i32>} : memref<1x8x1xf32, #tpu.memory_space<vmem>>, vector<1x8x1xf32>,
    %24 = vector.broadcast %14 : vector<8x1xf32> to vector<8x128xf32>
    %25 = arith.cmpf oeq, %8, %24 : vector<8x128xf32>
    %c128_i32 = arith.constant 128 : i32
    %26 = vector.broadcast %c128_i32 : i32 to vector<8x128xi32>
    %27 = arith.select %25, %4, %26 : vector<8x128xi1>, vector<8x128xi32>
    %cst_13 = arith.constant dense<2147483647> : vector<8xi32>
    %28 = vector.multi_reduction <minsi>, %27, %cst_13 [1] : vector<8x128xi32> to vector<8xi32>
    %29 = vector.shape_cast %28 : vector<8xi32> to vector<8x1xi32>
    %30 = vector.broadcast %29 : vector<8x1xi32> to vector<8x128xi32>
    %31 = arith.cmpi eq, %4, %30 : vector<8x128xi32>
    %32 = arith.extui %31 : vector<8x128xi1> to vector<8x128xi32>
    %33 = arith.sitofp %32 : vector<8x128xi32> to vector<8x128xf32>
    %34 = tpu.iota {dimensions = array<i32: 0>} : vector<8x128xi32>
    %c1_i32 = arith.constant 1 : i32
    %35 = tpu.dynamic_rotate %33 by %c1_i32 dim 0 : vector<8x128xf32>, i32 -> vector<8x128xf32>
    %c1_i32_14 = arith.constant 1 : i32
    %36 = vector.broadcast %c1_i32_14 : i32 to vector<8x128xi32>
    %37 = arith.cmpi sge, %34, %36 : vector<8x128xi32>
    %cst_15 = arith.constant 0.000000e+00 : f32
    %38 = vector.broadcast %cst_15 : f32 to vector<8x128xf32>
    %39 = arith.select %37, %35, %38 : vector<8x128xi1>, vector<8x128xf32>
    %40 = arith.addf %33, %39 : vector<8x128xf32>
    %c2_i32 = arith.constant 2 : i32
    %41 = tpu.dynamic_rotate %40 by %c2_i32 dim 0 : vector<8x128xf32>, i32 -> vector<8x128xf32>
    %c2_i32_16 = arith.constant 2 : i32
    %42 = vector.broadcast %c2_i32_16 : i32 to vector<8x128xi32>
    %43 = arith.cmpi sge, %34, %42 : vector<8x128xi32>
    %cst_17 = arith.constant 0.000000e+00 : f32
    %44 = vector.broadcast %cst_17 : f32 to vector<8x128xf32>
    %45 = arith.select %43, %41, %44 : vector<8x128xi1>, vector<8x128xf32>
    %46 = arith.addf %40, %45 : vector<8x128xf32>
    %c4_i32 = arith.constant 4 : i32
    %47 = tpu.dynamic_rotate %46 by %c4_i32 dim 0 : vector<8x128xf32>, i32 -> vector<8x128xf32>
    %c4_i32_18 = arith.constant 4 : i32
    %48 = vector.broadcast %c4_i32_18 : i32 to vector<8x128xi32>
    %49 = arith.cmpi sge, %34, %48 : vector<8x128xi32>
    %cst_19 = arith.constant 0.000000e+00 : f32
    %50 = vector.broadcast %cst_19 : f32 to vector<8x128xf32>
    %51 = arith.select %49, %47, %50 : vector<8x128xi1>, vector<8x128xf32>
    %52 = arith.addf %46, %51 : vector<8x128xf32>
    %53 = vector.broadcast %29 : vector<8x1xi32> to vector<8x128xi32>
    %54 = arith.cmpi eq, %4, %53 : vector<8x128xi32>
    %cst_20 = arith.constant 0.000000e+00 : f32
    %55 = vector.broadcast %cst_20 : f32 to vector<8x128xf32>
    %56 = arith.select %54, %52, %55 : vector<8x128xi1>, vector<8x128xf32>
    %cst_21 = arith.constant dense<0.000000e+00> : vector<8xf32>
    %57 = vector.multi_reduction <add>, %56, %cst_21 [1] : vector<8x128xf32> to vector<8xf32>
    %58 = vector.shape_cast %57 : vector<8xf32> to vector<8x1xf32>
    %cst_22 = arith.constant 3.000000e+00 : f32
    %59 = vector.broadcast %cst_22 : f32 to vector<8x1xf32>
    %60 = arith.cmpf ole, %58, %59 : vector<8x1xf32>
    %c0_i32 = arith.constant 0 : i32
    %61 = vector.broadcast %c0_i32 : i32 to vector<8x1xi32>
    %62 = arith.select %60, %29, %61 : vector<8x1xi1>, vector<8x1xi32>
    %c0_23 = arith.constant 0 : index
    %c0_24 = arith.constant 0 : index
    %c0_25 = arith.constant 0 : index
    %63 = vector.load %arg5[%c0_23, %c0_24, %c0_25] : memref<1x8x1xi32, #tpu.memory_space<vmem>>, vector<1x8x1xi32>
    %64 = vector.shape_cast %63 : vector<1x8x1xi32> to vector<8x1xi32>
    %65 = vector.shape_cast %62 : vector<8x1xi32> to vector<1x8x1xi32>
    tpu.vector_store %arg5[%c0_23, %c0_24, %c0_25], %65 {strides = array<i32>} : memref<1x8x1xi32, #tpu.memory_space<vmem>>, vector<1x8x1xi32>,
    %66 = arith.fptosi %58 : vector<8x1xf32> to vector<8x1xi32>
    %c1_i32_26 = arith.constant 1 : i32
    %67 = vector.broadcast %c1_i32_26 : i32 to vector<8x1xi32>
    %68 = arith.subi %66, %67 : vector<8x1xi32>
    %c-1_i32 = arith.constant -1 : i32
    %69 = vector.broadcast %c-1_i32 : i32 to vector<8x1xi32>
    %70 = arith.select %60, %68, %69 : vector<8x1xi1>, vector<8x1xi32>
    %c0_27 = arith.constant 0 : index
    %c0_28 = arith.constant 0 : index
    %c0_29 = arith.constant 0 : index
    %71 = vector.load %arg6[%c0_27, %c0_28, %c0_29] : memref<1x8x1xi32, #tpu.memory_space<vmem>>, vector<1x8x1xi32>
    %72 = vector.shape_cast %71 : vector<1x8x1xi32> to vector<8x1xi32>
    %73 = vector.shape_cast %70 : vector<8x1xi32> to vector<1x8x1xi32>
    tpu.vector_store %arg6[%c0_27, %c0_28, %c0_29], %73 {strides = array<i32>} : memref<1x8x1xi32, #tpu.memory_space<vmem>>, vector<1x8x1xi32>,
    return
  }
  func.func @transform_0(%arg0: i32) -> (i32, i32, i32) {
    %c0_i32 = arith.constant 0 : i32
    %c0_i32_0 = arith.constant 0 : i32
    %c0_i32_1 = arith.constant 0 : i32
    return %arg0, %c0_i32, %c0_i32_0 : i32, i32, i32
  }
  func.func @transform_1(%arg0: i32) -> (i32, i32) {
    %c0_i32 = arith.constant 0 : i32
    %c0_i32_0 = arith.constant 0 : i32
    %c0_i32_1 = arith.constant 0 : i32
    return %c0_i32, %c0_i32_0 : i32, i32
  }
  func.func @transform_2(%arg0: i32) -> (i32, i32, i32) {
    %c0_i32 = arith.constant 0 : i32
    %c0_i32_0 = arith.constant 0 : i32
    %c0_i32_1 = arith.constant 0 : i32
    return %arg0, %c0_i32, %c0_i32_0 : i32, i32, i32
  }
  func.func @transform_3(%arg0: i32) -> (i32, i32, i32) {
    %c0_i32 = arith.constant 0 : i32
    %c0_i32_0 = arith.constant 0 : i32
    %c0_i32_1 = arith.constant 0 : i32
    return %arg0, %c0_i32, %c0_i32_0 : i32, i32, i32
  }
  func.func @transform_4(%arg0: i32) -> (i32, i32, i32) {
    %c0_i32 = arith.constant 0 : i32
    %c0_i32_0 = arith.constant 0 : i32
    %c0_i32_1 = arith.constant 0 : i32
    return %arg0, %c0_i32, %c0_i32_0 : i32, i32, i32
  }
  func.func @transform_5(%arg0: i32) -> (i32, i32, i32) {
    %c0_i32 = arith.constant 0 : i32
    %c0_i32_0 = arith.constant 0 : i32
    %c0_i32_1 = arith.constant 0 : i32
    return %arg0, %c0_i32, %c0_i32_0 : i32, i32, i32
  }
}

</mosaic_0001>

<bundles_post_ra>
// kernel: tpu_custom_call.1
= control target key start
LH: loop header
LB: loop body
LE: loop exit
PB: predicated region body
PF: predicated region fallthrough
CT: control target
= control target key end

     0   :  { %11 = vsyncpa [#allocation3], 0  ;;  %s1010_s0 = inlined_call_operand.hbm [shape: f32[2,8,32], index: 0, kind: input, shape index: {}]   ;;  %s1011_s1 = inlined_call_operand.hbm [shape: f32[32,128], index: 1, kind: input, shape index: {}]   ;;  %s1012_s2 = inlined_call_operand.hbm [shape: f32[2,8,8], index: 2, kind: output, shape index: {0}]   ;;  %s1013_s3 = inlined_call_operand.vmem [shape: f32[2,8,1], index: 3, kind: output, shape index: {1}]   ;;  %s1014_s4 = inlined_call_operand.vmem [shape: s32[2,8,1], index: 4, kind: output, shape index: {2}]   ;;  %s1015_s5 = inlined_call_operand.vmem [shape: s32[2,8,1], index: 5, kind: output, shape index: {3}]  }
   0x1   :  { %13 = vsyncpa [#allocation3 + $0x1], 0 }
   0x2   :  { %14 = vsyncpa [#allocation6], 0 }
   0x3   :  { %15 = vsyncpa [#allocation4], 0 }
   0x4   :  { %17 = vsyncpa [#allocation4 + $0x1], 0  ;;  %s835_s18 = smov 0   ;;  %s837_s19 = smov 0  }
   0x5   :  { %s839_s20 = smov 0   ;;  %s841_s21 = smov 0  }
   0x6 LB: > { %s190_s24 = sshll.u32 %s1011_s1, 4  ;;  %s859_s25 = sadd.s32 4294967295, %s799_s21   ;;  %s799_s21 = sphi %s841_s21, %s1025_s21   ;;  %s795_s20 = sphi %s839_s20, %s1024_s20   ;;  %s791_s19 = sphi %s837_s19, %s1023_s19   ;;  %s787_s18 = sphi %s835_s18, %s1022_s18   ;;  %s191_s24 = int_to_ptr.hbm [resolvable:$true] %s190_s24 }
   0x7   : > { %p581_p0 = scmp.ge.s32.totalorder %s799_s21, 1  ;;  %p44_p1 = scmp.eq.s32.totalorder %s859_s25, 0 }
   0x8   : > { %p179_p2 = scmp.lt.s32.totalorder %s799_s21, 3  ;;  %s801_s27 = smov [#allocation5]  }
   0x9   : > { %s192_s28 = sshll.u32 %s801_s27, 4  ;;  %s802_s29 = smov 128   ;;  %s193_s28 = int_to_ptr.vmem [resolvable:$true] %s192_s28 }
   0xa   : > { %p864_p3 = pnand %p581_p0, %p179_p2  ;;  %s803_s30 = smov 8  }
   0xb   : > { %s580_s6 = sadd.s32 4294967294, %s799_s21   ;;  %s875_s7 = sadd.s32 1, %s799_s21  }
   0xc   : > { %p613_p4 = pneg %p864_p3  ;;  %s30_s8 = sadd.s32 1, %s795_s20 }
   0xd   : > { %s27_s9 = ssub.s32 %s799_s21, %s875_s7  ;;  %p37_p7 = scmp.ne.s32.totalorder %s795_s20, %s791_s19 }
   0xe   : > { %p614_p6 = pnand %p613_p4, %p44_p1  ;;  %p28_p8 = scmp.eq.s32.totalorder %s27_s9, 0 }
   0xf   : > { %p38_p9 = scmp.eq.s32.totalorder %s799_s21, 0  ;;  %p43_p10 = scmp.ne.s32.totalorder %s791_s19, %s787_s18 }
  0x10   : > { %616 = dma.hbm_to_vmem [thread:$0]  (!%p614_p6), %s191_s24, 512, %s193_s28, [#allocation6], %s802_s29, %s802_s29, %s803_s30  }
  0x11   : > { %p88_p11 = scmp.eq.s32.totalorder %s859_s25, 1  ;;  %p891_p12 = por %p44_p1, %p43_p10 }
  0x12   : > { %s887_s10 = scalar_select %p28_p8, %s795_s20, %s30_s8  }
  0x13   : > { %p895_p13 = por %p88_p11, %p37_p7  ;;  %p94_p0 = scmp.eq.s32.totalorder %s580_s6, 1 }
  0x14   : > { %p39_p2 = por %p38_p9, %p37_p7  ;;  %s206_s13 = sand.u32 1, %s795_s20  }
  0x15   : > { %p900_p4 = por %p94_p0, %p43_p10  ;;  %p626_p6 = scmp.lt.s32.totalorder %s799_s21, 2 }
  0x16   : > { %s584_s15 = sshll.u32 %s206_s13, 3  ;;  %s585_s16 = sshll.u32 %s799_s21, 3 }
  0x17   : > { %s214_s23 = scalar_lea.hbm %s1010_s0, %s585_s16  ;;  %s210_s27 = scalar_lea.vmem [#allocation2], %s584_s15 }
  0x18   : > { %s216_s24 = sshll.u32 %s214_s23, 4  ;;  %s218_s28 = sshll.u32 %s210_s27, 4  ;;  %s217_s24 = int_to_ptr.hbm [resolvable:$true] %s216_s24  ;;  %s219_s28 = int_to_ptr.vmem [resolvable:$true] %s218_s28 }
  0x19   : > { %p909_p8 = pnand %p626_p6, %p39_p2  ;;  %s207_s30 = scalar_lea.sflag [#allocation3], %s206_s13 }
  0x1a   : > { %s699_s6 = sshra.s32 %s217_s24, 4  ;;  %s706_s15 = scalar_lea.hbm %s1010_s0, 16  ;;  %s700_s6 = int_to_ptr.hbm [resolvable:$true] %s699_s6 }
  0x1b   : > { %s701_s8 = scalar_lea.hbm %s700_s6, 8  ;;  %p703_p9 = pneg %p909_p8 }
  0x1c   : > { %p702_p7 = scmp.ne.s32.totalorder %s700_s6, %s701_s8  ;;  %p707_p0 = scmp.lt.s32.totalorder %s700_s6, %s1010_s0 }
  0x1d   : > { %p708_p2 = scmp.lt.s32.totalorder %s706_s15, %s701_s8 }
  0x1e   : > { %p704_p10 = pnand %p703_p9, %p702_p7 }
  0x1f   : > { %p709_p6 = por %p708_p2, %p707_p0 }
  0x20   : > { %p705_p11 = pneg %p704_p10 }
  0x22   : > { %p710_p5 = pnand %p709_p6, %p705_p11 }
  0x24   : > { %713 = shalt.err (!%p710_p5)
}
  0x25   : > { %620 = dma.hbm_to_vmem [thread:$0]  (!%p909_p8), %s217_s24, 128, %s219_s28, %s207_s30  }
  0x26   : > { %227 = sbr.rel (%p864_p3) target bundleno = 685 (0x2ad), region = 28  ;;  %s926_s13 = sand.u32 (!%p864_p3), 1, %s791_s19  }
  0x27   : > { %s587_s23 = sshll.u32 (!%p864_p3), %s926_s13, 3  ;;  %s230_s27 = scalar_lea.sflag (!%p864_p3), [#allocation3], %s926_s13 }
  0x28   : > { %s233_s9 = scalar_lea.vmem (!%p864_p3), [#allocation2], %s587_s23 }
  0x2b   : > { %774 = dma.done.wait (%p891_p12), %s230_s27, 128  }
  0x2c   : > { %776 = vsyncadd (%p891_p12), %s230_s27, 4294967168 }
  0x2d   : > { %778 = dma.done.wait (%p44_p1), [#allocation6], 512  }
  0x2e   : > { %780 = vsyncadd (%p44_p1), [#allocation6], 4294966784  ;;  %v294_v0 = vld [vmem:[#allocation5 + $0x18] sm:$0xff]  ;;  %v293_v1 = vld [vmem:[#allocation5 + $0x10] sm:$0xff]  ;;  %vm295_vm0 = vcmask 261120   ;;  %v319_v5 = vlaneseq  ;;  %vm323_vm2 = vcmask 64512  }
  0x2f   : > { %311 = vmatpush.msra.mxu0 %v294_v0  ;;  %v292_v2 = vld [vmem:[#allocation5 + $0x8] sm:$0xff]  ;;  %v291_v3 = vld [vmem:[#allocation5] sm:$0xff]  ;;  %v290_v4 = vld [vmem:[%s233_s9] sm:$0xff]  ;;  %s941_s26 = scalar_lea.vmem [#allocation7], %s587_s23  ;;  %v804_v26 = vmov 0.0   ;;  %p278_p1 = scmp.lt.s32.totalorder %s859_s25, 1 }
  0x30   : > { %v938_v6 = vand.u32 127, %v319_v5  ;;  %v368_v25 = vshrl.u32 %v319_v5, 7  ;;  %s597_s24 = sshll.u32 %s859_s25, 3  ;;  %s416_s6 = sshll.u32 %s941_s26, 4  ;;  %s417_s6 = int_to_ptr.vmem [resolvable:$true] %s416_s6 }
  0x31   : > { %312 = vmatpush.msra.mxu0 %v293_v1  ;;  %s279_s11 = scalar_select %p278_p1, %s859_s25, 1 }
  0x32   : > { %vm321_vm1 = vcmp.lt.s32.totalorder %v938_v6, 8  ;;  %vm370_vm6 = vcmp.ge.s32.totalorder %v368_v25, 1  ;;  %vm374_vm7 = vcmp.ge.s32.totalorder %v368_v25, 2  ;;  %vm378_vm8 = vcmp.ge.s32.totalorder %v368_v25, 4  ;;  %s414_s30 = scalar_lea.hbm %s1012_s2, %s597_s24  ;;  %s392_s25 = scalar_lea.sflag [#allocation4], %s926_s13 }
  0x33   : > { %313 = vmatpush.msra.mxu0 %v292_v2  ;;  %s418_s8 = sshll.u32 %s414_s30, 4  ;;  %s959_s16 = sshll.u32 %s279_s11, 3  ;;  %s419_s8 = int_to_ptr.hbm [resolvable:$true] %s418_s8 }
  0x34   : > { %s743_s15 = sshra.s32 %s419_s8, 4  ;;  %s749_s27 = scalar_lea.hbm %s1012_s2, 16  ;;  %s744_s15 = int_to_ptr.hbm [resolvable:$true] %s743_s15 }
  0x35   : > { %314 = vmatpush.msra.mxu0 %v291_v3  ;;  %s745_s17 = scalar_lea.hbm %s744_s15, 8  ;;  %p750_p8 = scmp.lt.s32.totalorder %s744_s15, %s1012_s2 }
  0x36   : > { %593 = vmatmul.msk.f32.vlgmr.msra.gmra.mxu0 %vm295_vm0, %v290_v4  ;;  %p746_p3 = scmp.ne.s32.totalorder %s744_s15, %s745_s17  ;;  %p751_p7 = scmp.lt.s32.totalorder %s749_s27, %s745_s17 }
  0x38   : > { %p747_p5 = pnand %p746_p3, %p895_p13  ;;  %p752_p9 = por %p751_p7, %p750_p8 }
  0x3a   : > { %p748_p12 = pneg %p747_p5 }
  0x3c   : > { %p753_p10 = pnand %p752_p9, %p748_p12 }
  0xb3   : > { %v316_v7 = vpop.f32.mrf.mxu0 }
  0xb4   : > { %v322_v8 = vsel %vm321_vm1, %v316_v7, -1e+30 }
  0xb5   : > { %324 = vst.msk [vmem:[%s941_s26] sm:$0xff] %vm323_vm2, %v322_v8  ;;  %325 = vmax.xlane.f32.xlu0 %v322_v8 }
 0x128   : > { %v326_v9 = vpop.xlane.xlu0 %325 }
 0x129   : > { %vm348_vm3 = vcmp.eq.f32.partialorder %v322_v8, %v326_v9  ;;  %v327_v13 = vsub.f32 %v322_v8, %v326_v9 }
 0x12a   : > { %v349_v10 = vsel %vm348_vm3, %v938_v6, 128 }
 0x12b   : > { %v351_v11 = vshra.s32 %v349_v10, 16  ;;  %v350_v14 = vand.u32 65535, %v349_v10  ;;  %v328_v15 = vmul.f32 1.442695, %v327_v13 }
 0x12d   : > { %v353_v12 = vcvt.s32.f32 %v351_v11  ;;  %v352_v17 = vcvt.s32.f32 %v350_v14  ;;  %665 = vpow2.f32 %v328_v15 }
 0x12f   : > { %354 = vmin.xlane.f32.xlu0 %v353_v12 }
 0x133   : > { %v666_v19 = vpop.eup %665 }
 0x1a2   : > { %v355_v16 = vpop.xlane.xlu0 %354 }
 0x1a3   : > { %vm356_vm4 = vcmp.eq.f32.partialorder %v353_v12, %v355_v16  ;;  %v361_v20 = vcvt.f32.s32 %v355_v16 }
 0x1a4   : > { %v357_v18 = vsel %vm356_vm4, %v352_v17, inf }
 0x1a5   : > { %358 = vmin.xlane.f32.xlu1 %v357_v18  ;;  %v362_v22 = vshll.u32 %v361_v20, 16 }
 0x1ad   : > { %330 = vadd.xlane.f32.xlu1 %v666_v19 }
 0x218   : > { %v359_v21 = vpop.xlane.xlu1 %358 }
 0x219   : > { %v360_v23 = vcvt.f32.s32 %v359_v21 }
 0x21b   : > { %v945_v24 = vadd.s32 %v362_v22, %v360_v23 }
 0x21d   : > { %vm364_vm5 = vcmp.eq.s32.totalorder %v938_v6, %v945_v24 }
 0x21e   : > { %v594_v27 = vsel %vm364_vm5, 1.0, %v804_v26 }
 0x21f   : > { %v369_v28 = vrot.slane %v594_v27, 7 }
 0x220   : > { %v331_v29 = vpop.xlane.xlu1 %330 }
 0x221   : > { %667 = vrcp.f32 %v331_v29  ;;  %v371_v30 = vsel %vm370_vm6, %v369_v28, 0.0  ;;  %v343_v39 = vand.u32 2147483648, %v331_v29  ;;  %v341_v41 = vand.u32 2147483647, %v331_v29 }
 0x222   : > { %v372_v31 = vadd.f32 %v594_v27, %v371_v30 }
 0x224   : > { %v373_v32 = vrot.slane %v372_v31, 6 }
 0x226   : > { %v375_v34 = vsel %vm374_vm7, %v373_v32, 0.0 }
 0x227   : > { %v668_v33 = vpop.eup %667  ;;  %v376_v36 = vadd.f32 %v375_v34, %v372_v31 }
 0x228   : > { %v333_v35 = vmul.f32 %v668_v33, %v331_v29  ;;  %vm338_vm9 = vweird.f32 %v668_v33 }
 0x229   : > { %v377_v38 = vrot.slane %v376_v36, 4 }
 0x22a   : > { %v334_v37 = vsub.f32 1.0, %v333_v35 }
 0x22b   : > { %v379_v42 = vsel %vm378_vm8, %v377_v38, 0.0 }
 0x22c   : > { %v335_v40 = vmul.f32 %v668_v33, %v334_v37  ;;  %v380_v43 = vadd.f32 %v379_v42, %v376_v36 }
 0x22d   : > { %756 = shalt.err (!%p753_p10)
}
 0x22e   : > { %611 = dma.vmem_to_hbm [thread:$0]  (%p895_p13), %s417_s6, 128, %s419_s8, %s392_s25   ;;  %v336_v44 = vadd.f32 %v668_v33, %v335_v40  ;;  %vm337_vm10 = vweird.f32 %v331_v29  ;;  %vm346_vm11 = vcmask 7168   ;;  %v344_v45 = vor.u32 1.1754944e-38, %v343_v39 }
 0x22f   : > { %s281_s24 = scalar_lea.vmem %s1013_s3, %s959_s16  ;;  %vm339_vm12 = vmor %vm337_vm10, %vm338_vm9  ;;  %v381_v46 = vsel %vm364_vm5, %v380_v43, 0.0  ;;  %vm342_vm13 = vcmp.eq.f32.partialorder %v341_v41, 8.507059e+37  ;;  %s285_s29 = scalar_lea.vmem %s1014_s4, %s959_s16 }
 0x230   : > { %v340_v47 = vsel %vm339_vm12, %v668_v33, %v336_v44  ;;  %382 = vadd.xlane.f32.xlu2 %v381_v46  ;;  %s289_s8 = scalar_lea.vmem %s1015_s5, %s959_s16 }
 0x231   : > { %v345_v48 = vsel %vm342_vm13, %v344_v45, %v340_v47 }
 0x232   : > { %347 = vst.msk [vmem:[%s281_s24] sm:$0xff] %vm346_vm11, %v345_v48 }
 0x2a3   : > { %v383_v49 = vpop.xlane.xlu2 %382 }
 0x2a4   : > { %vm384_vm14 = vcmp.le.f32.partialorder %v383_v49, 3.0  ;;  %vm600_vm15 = vcmp.lt.s32.totalorder %v383_v49, 0  ;;  %v601_v50 = vceil.f32 %v383_v49  ;;  %v602_v51 = vfloor.f32 %v383_v49 }
 0x2a5   : > { %v385_v52 = vsel %vm384_vm14, %v945_v24, 0 }
 0x2a6   : > { %386 = vst.msk [vmem:[%s285_s29] sm:$0xff] %vm346_vm11, %v385_v52  ;;  %v603_v53 = vsel %vm600_vm15, %v601_v50, %v602_v51 }
 0x2a7   : > { %v604_v54 = vcvt.f32.s32 %v603_v53 }
 0x2a9   : > { %v595_v55 = vadd.s32 4294967295, %v604_v54 }
 0x2ab   : > { %v389_v56 = vsel %vm384_vm14, %v595_v55, 4294967295 }
 0x2ac   : > { %390 = vst.msk [vmem:[%s289_s8] sm:$0xff] %vm346_vm11, %v389_v56 }
 0x2ad PF: > { %s439_s25 = sand.u32 1, %s787_s18   ;;  %p1021_p13 = scmp.ge.s32.totalorder %s799_s21, 2 }
 0x2ae   : > { %s440_s15 = scalar_lea.sflag [#allocation4], %s439_s25 }
 0x2af   : > { %p622_p11 = pnand %p1021_p13, %p900_p4 }
 0x2b1   : > { %p623_p0 = pneg %p622_p11 }
 0x2b3   : > { %782 = dma.done.wait (%p623_p0), %s440_s15, 128  }
 0x2b4   : > { %784 = vsyncadd (%p623_p0), %s440_s15, 4294967168  ;;  %p20_p2 = scmp.ge.s32.totalorder %s875_s7, 4   ;;  %s1022_s18 = smov %s791_s19 }
 0x2b5   : > { %s1023_s19 = smov %s795_s20  ;;  %s1024_s20 = smov %s887_s10 }
 0x2b6   : > { %s1025_s21 = smov %s875_s7  ;;  %22 = sbr.rel (!%p20_p2) target bundleno = 6 (0x6), region = 113 }
 0x2bb   :  { %467 = vsyncpa [#allocation3], 1 }
 0x2bc   :  { %469 = vsyncpa [#allocation3 + $0x1], 1 }
 0x2bd   :  { %470 = vsyncpa [#allocation6], 1 }
 0x2be   :  { %471 = vsyncpa [#allocation4], 1 }
 0x2bf   :  { %473 = vsyncpa [#allocation4 + $0x1], 1 }

</bundles_post_ra>
